<compile_context>
chip_gen: v6e
topology: v6e:2x2x1
jax: 0.10.0
libtpu: 0.0.40
codegen_flags: <defaults>
</compile_context>

<pallas_src>
import jax
import jax.numpy as jnp
from jax.experimental import pallas as pl
from jax.experimental.pallas import tpu as pltpu


LANES = 128          # lane width: every layer dim is zero-padded to this
N_LAYERS = 8         # enc1, enc2, enc3, A, dec1, dec2, dec3, dec4


# -----------------------------------------------------------------------------
# Kernel
# -----------------------------------------------------------------------------
def rsrae_linear_kernel(x_ref, w_ref, b_ref, out_ref):
    """x_ref:  (Bp, 128) f32   padded input
       w_ref:  (8, 128, 128) bf16  packed, zero-padded weights (stored (in,out))
       b_ref:  (8, 128) f32    packed, zero-padded biases (row 3 == 0 for A)
       out_ref:(3, Bp, 128) f32  lane-dense output slab: [y, y_rsr, x_r]"""
    h = x_ref[...]                                      # (Bp, 128) f32

    def matmul(a, i):
        # bf16 operands, f32 accumulation -> native single-pass MXU path.
        return jnp.dot(a.astype(jnp.bfloat16), w_ref[i],
                       preferred_element_type=jnp.float32)

    def linear_relu(a, i):
        o = matmul(a, i) + b_ref[pl.ds(i, 1), :]        # bias add in f32
        return jnp.maximum(o, 0.0)                      # ReLU in f32

    # ---- encoder: Linear+ReLU x3 ----
    h = linear_relu(h, 0)
    h = linear_relu(h, 1)
    y = linear_relu(h, 2)
    out_ref[0] = y

    # ---- RSR projection: y_rsr = y @ A (no bias, no activation) ----
    # renorm=False in the module, so z == y_rsr; z is aliased in the wrapper.
    y_rsr = matmul(y, 3)
    out_ref[1] = y_rsr

    # ---- decoder: Linear+ReLU x4 ----
    d = linear_relu(y_rsr, 4)
    d = linear_relu(d, 5)
    d = linear_relu(d, 6)
    x_r = linear_relu(d, 7)
    out_ref[2] = x_r


# -----------------------------------------------------------------------------
# Parameter packing (done once, outside the kernel)
# -----------------------------------------------------------------------------
def _pad2d(a, rows, cols):
    a = jnp.asarray(a, jnp.float32)
    return jnp.pad(a, ((0, rows - a.shape[0]), (0, cols - a.shape[1])))


def pack_params(params):
    """Pack all weights into one bf16 (8,128,128) slab and all biases into one
    f32 (8,128) slab.  Weights are stored (in, out); pad regions are zero."""
    w_names = ("we1", "we2", "we3", "A", "wd1", "wd2", "wd3", "wd4")
    b_names = ("be1", "be2", "be3", None, "bd1", "bd2", "bd3", "bd4")

    for n in w_names:
        assert params[n].shape[0] <= LANES and params[n].shape[1] <= LANES

    w_slab = jnp.stack([_pad2d(params[n], LANES, LANES) for n in w_names])
    w_slab = w_slab.astype(jnp.bfloat16)                # (8, 128, 128) bf16

    b_rows = []
    for n in b_names:
        if n is None:
            b_rows.append(jnp.zeros((LANES,), jnp.float32))
        else:
            b = jnp.asarray(params[n], jnp.float32).reshape(-1)
            b_rows.append(jnp.pad(b, (0, LANES - b.shape[0])))
    b_slab = jnp.stack(b_rows)                          # (8, 128) f32
    return w_slab, b_slab


# -----------------------------------------------------------------------------
# Wrapper
# -----------------------------------------------------------------------------
def rsrae_linear_forward(x, w_slab, b_slab, dims):
    """dims: dict with 'c' (input/output channels), 'h2' (encoder output dim),
    'zc' (z channels).  Returns (y, y_rsr, z, x_r) with their true shapes."""
    c, h2, zc = dims["c"], dims["h2"], dims["zc"]
    B = x.shape[0]
    Bp = ((B + 7) // 8) * 8                             # sublane-align batch

    x_pad = jnp.zeros((Bp, LANES), jnp.float32).at[:B, :c].set(
        x.astype(jnp.float32))

    vmem = pl.BlockSpec(memory_space=pltpu.MemorySpace.VMEM)

    out = pl.pallas_call(
        rsrae_linear_kernel,
        out_shape=jax.ShapeDtypeStruct((3, Bp, LANES), jnp.float32),
        in_specs=[vmem, vmem, vmem],
        out_specs=vmem,
    )(x_pad, w_slab, b_slab)

    y = out[0, :B, :h2]
    y_rsr = out[1, :B, :zc]
    z = y_rsr                      # renorm=False  ->  z is exactly y_rsr
    x_r = out[2, :B, :c]
    return y, y_rsr, z, x_r


# -----------------------------------------------------------------------------
# Params / reference
# -----------------------------------------------------------------------------
def init_params(key, c, hidden_layer_sizes, z_channels):
    h0, h1, h2 = hidden_layer_sizes
    keys = jax.random.split(key, 16)

    def w(k, fan_in, fan_out):
        return (jax.random.normal(k, (fan_in, fan_out), jnp.float32)
                * (1.0 / jnp.sqrt(fan_in)))

    def b(k, fan_out):
        return jax.random.normal(k, (1, fan_out), jnp.float32) * 0.01

    return {
        # encoder: c -> h0 -> h1 -> h2
        "we1": w(keys[0], c, h0), "be1": b(keys[1], h0),
        "we2": w(keys[2], h0, h1), "be2": b(keys[3], h1),
        "we3": w(keys[4], h1, h2), "be3": b(keys[5], h2),
        # RSR matrix A: (h2, z_channels)
        "A": jax.random.normal(keys[6], (h2, z_channels), jnp.float32),
        # decoder: z -> h2 -> h1 -> h0 -> c
        "wd1": w(keys[7], z_channels, h2), "bd1": b(keys[8], h2),
        "wd2": w(keys[9], h2, h1), "bd2": b(keys[10], h1),
        "wd3": w(keys[11], h1, h0), "bd3": b(keys[12], h0),
        "wd4": w(keys[13], h0, c), "bd4": b(keys[14], c),
    }


def reference_forward(x, p, operand_dtype=jnp.float32):
    """Pure-JAX reference.  operand_dtype=bfloat16 mimics the kernel's MXU
    operand cast (f32 accumulation either way)."""
    def dot(a, w):
        return jnp.dot(a.astype(operand_dtype), w.astype(operand_dtype),
                       preferred_element_type=jnp.float32)
    relu = lambda v: jnp.maximum(v, 0.0)
    h = relu(dot(x, p["we1"]) + p["be1"])
    h = relu(dot(h, p["we2"]) + p["be2"])
    y = relu(dot(h, p["we3"]) + p["be3"])
    y_rsr = dot(y, p["A"])
    z = y_rsr
    d = relu(dot(y_rsr, p["wd1"]) + p["bd1"])
    d = relu(dot(d, p["wd2"]) + p["bd2"])
    d = relu(dot(d, p["wd3"]) + p["bd3"])
    x_r = relu(dot(d, p["wd4"]) + p["bd4"])
    return y, y_rsr, z, x_r


# -----------------------------------------------------------------------------
# Demo / self-check
# -----------------------------------------------------------------------------
if __name__ == "__main__":
    key = jax.random.PRNGKey(0)
    k_x, k_p = jax.random.split(key)

    B = 8
    c = 16                        # input feature dim
    hidden_layer_sizes = (32, 24, 16)
    z_channels = 8

    x = jax.random.normal(k_x, (B, c), jnp.float32)
    params = init_params(k_p, c, hidden_layer_sizes, z_channels)

    # Pack parameters once (amortized across calls).
    w_slab, b_slab = pack_params(params)
    dims = {"c": c, "h2": hidden_layer_sizes[2], "zc": z_channels}

    fwd = jax.jit(lambda xx: rsrae_linear_forward(xx, w_slab, b_slab, dims))
    y, y_rsr, z, x_r = jax.block_until_ready(fwd(x))

    # --- shape checks ---
    assert y.shape == (B, hidden_layer_sizes[2])
    assert y_rsr.shape == (B, z_channels)
    assert z.shape == (B, z_channels)
    assert x_r.shape == (B, c)

    # --- tight check vs bf16-operand reference (same arithmetic as kernel) ---
    refs_bf16 = reference_forward(x, params, jnp.bfloat16)
    for got, want in zip((y, y_rsr, z, x_r), refs_bf16):
        assert jnp.allclose(got, want, atol=5e-3, rtol=1e-3)

    # --- loose check vs full-f32 reference (bf16 MXU operands in kernel) ---
    refs_f32 = reference_forward(x, params, jnp.float32)
    for got, want in zip((y, y_rsr, z, x_r), refs_f32):
        assert jnp.allclose(got, want, atol=8e-2, rtol=8e-2)

    print("KERNEL_OK")
</pallas_src>

<mosaic_0001>
module attributes {stable_mosaic.version = 11 : i64} {
  func.func @rsrae_linear_kernel(%arg0: memref<8x128xf32, #tpu.memory_space<vmem>>, %arg1: memref<8x128x128xbf16, #tpu.memory_space<vmem>>, %arg2: memref<8x128xf32, #tpu.memory_space<vmem>>, %arg3: memref<3x8x128xf32, #tpu.memory_space<vmem>>) attributes {dimension_semantics = [], scalar_prefetch = 0 : i64, scratch_operands = 0 : i64, tpu.core_type = #tpu.core_type<tc>} {
    %c0 = arith.constant 0 : index
    %c0_0 = arith.constant 0 : index
    %0 = vector.load %arg0[%c0, %c0_0] : memref<8x128xf32, #tpu.memory_space<vmem>>, vector<8x128xf32>
    %1 = arith.truncf %0 : vector<8x128xf32> to vector<8x128xbf16>
    %c0_1 = arith.constant 0 : index
    %c0_2 = arith.constant 0 : index
    %c0_3 = arith.constant 0 : index
    %2 = vector.load %arg1[%c0_1, %c0_2, %c0_3] : memref<8x128x128xbf16, #tpu.memory_space<vmem>>, vector<1x128x128xbf16>
    %3 = vector.shape_cast %2 : vector<1x128x128xbf16> to vector<128x128xbf16>
    %cst = arith.constant dense<0.000000e+00> : vector<8x128xf32>
    %4 = tpu.matmul %1, %3, %cst {dimension_numbers = #tpu.dot_dimension_numbers<[1], [0], [0], [1], [0, 0, 1, 1], [], []>} : vector<8x128xbf16>, vector<128x128xbf16>, vector<8x128xf32> -> vector<8x128xf32>
    %c0_4 = arith.constant 0 : index
    %c0_5 = arith.constant 0 : index
    %5 = vector.load %arg2[%c0_4, %c0_5] : memref<8x128xf32, #tpu.memory_space<vmem>>, vector<1x128xf32>
    %6 = vector.broadcast %5 : vector<1x128xf32> to vector<8x128xf32>
    %7 = arith.addf %4, %6 : vector<8x128xf32>
    %cst_6 = arith.constant 0.000000e+00 : f32
    %8 = vector.broadcast %cst_6 : f32 to vector<8x128xf32>
    %9 = arith.maximumf %7, %8 : vector<8x128xf32>
    %10 = arith.truncf %9 : vector<8x128xf32> to vector<8x128xbf16>
    %c1 = arith.constant 1 : index
    %c0_7 = arith.constant 0 : index
    %c0_8 = arith.constant 0 : index
    %11 = vector.load %arg1[%c1, %c0_7, %c0_8] : memref<8x128x128xbf16, #tpu.memory_space<vmem>>, vector<1x128x128xbf16>
    %12 = vector.shape_cast %11 : vector<1x128x128xbf16> to vector<128x128xbf16>
    %cst_9 = arith.constant dense<0.000000e+00> : vector<8x128xf32>
    %13 = tpu.matmul %10, %12, %cst_9 {dimension_numbers = #tpu.dot_dimension_numbers<[1], [0], [0], [1], [0, 0, 1, 1], [], []>} : vector<8x128xbf16>, vector<128x128xbf16>, vector<8x128xf32> -> vector<8x128xf32>
    %c1_10 = arith.constant 1 : index
    %c0_11 = arith.constant 0 : index
    %14 = vector.load %arg2[%c1_10, %c0_11] : memref<8x128xf32, #tpu.memory_space<vmem>>, vector<1x128xf32>
    %15 = vector.broadcast %14 : vector<1x128xf32> to vector<8x128xf32>
    %16 = arith.addf %13, %15 : vector<8x128xf32>
    %cst_12 = arith.constant 0.000000e+00 : f32
    %17 = vector.broadcast %cst_12 : f32 to vector<8x128xf32>
    %18 = arith.maximumf %16, %17 : vector<8x128xf32>
    %19 = arith.truncf %18 : vector<8x128xf32> to vector<8x128xbf16>
    %c2 = arith.constant 2 : index
    %c0_13 = arith.constant 0 : index
    %c0_14 = arith.constant 0 : index
    %20 = vector.load %arg1[%c2, %c0_13, %c0_14] : memref<8x128x128xbf16, #tpu.memory_space<vmem>>, vector<1x128x128xbf16>
    %21 = vector.shape_cast %20 : vector<1x128x128xbf16> to vector<128x128xbf16>
    %cst_15 = arith.constant dense<0.000000e+00> : vector<8x128xf32>
    %22 = tpu.matmul %19, %21, %cst_15 {dimension_numbers = #tpu.dot_dimension_numbers<[1], [0], [0], [1], [0, 0, 1, 1], [], []>} : vector<8x128xbf16>, vector<128x128xbf16>, vector<8x128xf32> -> vector<8x128xf32>
    %c2_16 = arith.constant 2 : index
    %c0_17 = arith.constant 0 : index
    %23 = vector.load %arg2[%c2_16, %c0_17] : memref<8x128xf32, #tpu.memory_space<vmem>>, vector<1x128xf32>
    %24 = vector.broadcast %23 : vector<1x128xf32> to vector<8x128xf32>
    %25 = arith.addf %22, %24 : vector<8x128xf32>
    %cst_18 = arith.constant 0.000000e+00 : f32
    %26 = vector.broadcast %cst_18 : f32 to vector<8x128xf32>
    %27 = arith.maximumf %25, %26 : vector<8x128xf32>
    %c0_19 = arith.constant 0 : index
    %c0_20 = arith.constant 0 : index
    %c0_21 = arith.constant 0 : index
    %28 = vector.load %arg3[%c0_19, %c0_20, %c0_21] : memref<3x8x128xf32, #tpu.memory_space<vmem>>, vector<1x8x128xf32>
    %29 = vector.shape_cast %28 : vector<1x8x128xf32> to vector<8x128xf32>
    %30 = vector.shape_cast %27 : vector<8x128xf32> to vector<1x8x128xf32>
    tpu.vector_store %arg3[%c0_19, %c0_20, %c0_21], %30 {strides = array<i32>} : memref<3x8x128xf32, #tpu.memory_space<vmem>>, vector<1x8x128xf32>,
    %31 = arith.truncf %27 : vector<8x128xf32> to vector<8x128xbf16>
    %c3 = arith.constant 3 : index
    %c0_22 = arith.constant 0 : index
    %c0_23 = arith.constant 0 : index
    %32 = vector.load %arg1[%c3, %c0_22, %c0_23] : memref<8x128x128xbf16, #tpu.memory_space<vmem>>, vector<1x128x128xbf16>
    %33 = vector.shape_cast %32 : vector<1x128x128xbf16> to vector<128x128xbf16>
    %cst_24 = arith.constant dense<0.000000e+00> : vector<8x128xf32>
    %34 = tpu.matmul %31, %33, %cst_24 {dimension_numbers = #tpu.dot_dimension_numbers<[1], [0], [0], [1], [0, 0, 1, 1], [], []>} : vector<8x128xbf16>, vector<128x128xbf16>, vector<8x128xf32> -> vector<8x128xf32>
    %c1_25 = arith.constant 1 : index
    %c0_26 = arith.constant 0 : index
    %c0_27 = arith.constant 0 : index
    %35 = vector.load %arg3[%c1_25, %c0_26, %c0_27] : memref<3x8x128xf32, #tpu.memory_space<vmem>>, vector<1x8x128xf32>
    %36 = vector.shape_cast %35 : vector<1x8x128xf32> to vector<8x128xf32>
    %37 = vector.shape_cast %34 : vector<8x128xf32> to vector<1x8x128xf32>
    tpu.vector_store %arg3[%c1_25, %c0_26, %c0_27], %37 {strides = array<i32>} : memref<3x8x128xf32, #tpu.memory_space<vmem>>, vector<1x8x128xf32>,
    %38 = arith.truncf %34 : vector<8x128xf32> to vector<8x128xbf16>
    %c4 = arith.constant 4 : index
    %c0_28 = arith.constant 0 : index
    %c0_29 = arith.constant 0 : index
    %39 = vector.load %arg1[%c4, %c0_28, %c0_29] : memref<8x128x128xbf16, #tpu.memory_space<vmem>>, vector<1x128x128xbf16>
    %40 = vector.shape_cast %39 : vector<1x128x128xbf16> to vector<128x128xbf16>
    %cst_30 = arith.constant dense<0.000000e+00> : vector<8x128xf32>
    %41 = tpu.matmul %38, %40, %cst_30 {dimension_numbers = #tpu.dot_dimension_numbers<[1], [0], [0], [1], [0, 0, 1, 1], [], []>} : vector<8x128xbf16>, vector<128x128xbf16>, vector<8x128xf32> -> vector<8x128xf32>
    %c4_31 = arith.constant 4 : index
    %c0_32 = arith.constant 0 : index
    %42 = vector.load %arg2[%c4_31, %c0_32] : memref<8x128xf32, #tpu.memory_space<vmem>>, vector<1x128xf32>
    %43 = vector.broadcast %42 : vector<1x128xf32> to vector<8x128xf32>
    %44 = arith.addf %41, %43 : vector<8x128xf32>
    %cst_33 = arith.constant 0.000000e+00 : f32
    %45 = vector.broadcast %cst_33 : f32 to vector<8x128xf32>
    %46 = arith.maximumf %44, %45 : vector<8x128xf32>
    %47 = arith.truncf %46 : vector<8x128xf32> to vector<8x128xbf16>
    %c5 = arith.constant 5 : index
    %c0_34 = arith.constant 0 : index
    %c0_35 = arith.constant 0 : index
    %48 = vector.load %arg1[%c5, %c0_34, %c0_35] : memref<8x128x128xbf16, #tpu.memory_space<vmem>>, vector<1x128x128xbf16>
    %49 = vector.shape_cast %48 : vector<1x128x128xbf16> to vector<128x128xbf16>
    %cst_36 = arith.constant dense<0.000000e+00> : vector<8x128xf32>
    %50 = tpu.matmul %47, %49, %cst_36 {dimension_numbers = #tpu.dot_dimension_numbers<[1], [0], [0], [1], [0, 0, 1, 1], [], []>} : vector<8x128xbf16>, vector<128x128xbf16>, vector<8x128xf32> -> vector<8x128xf32>
    %c5_37 = arith.constant 5 : index
    %c0_38 = arith.constant 0 : index
    %51 = vector.load %arg2[%c5_37, %c0_38] : memref<8x128xf32, #tpu.memory_space<vmem>>, vector<1x128xf32>
    %52 = vector.broadcast %51 : vector<1x128xf32> to vector<8x128xf32>
    %53 = arith.addf %50, %52 : vector<8x128xf32>
    %cst_39 = arith.constant 0.000000e+00 : f32
    %54 = vector.broadcast %cst_39 : f32 to vector<8x128xf32>
    %55 = arith.maximumf %53, %54 : vector<8x128xf32>
    %56 = arith.truncf %55 : vector<8x128xf32> to vector<8x128xbf16>
    %c6 = arith.constant 6 : index
    %c0_40 = arith.constant 0 : index
    %c0_41 = arith.constant 0 : index
    %57 = vector.load %arg1[%c6, %c0_40, %c0_41] : memref<8x128x128xbf16, #tpu.memory_space<vmem>>, vector<1x128x128xbf16>
    %58 = vector.shape_cast %57 : vector<1x128x128xbf16> to vector<128x128xbf16>
    %cst_42 = arith.constant dense<0.000000e+00> : vector<8x128xf32>
    %59 = tpu.matmul %56, %58, %cst_42 {dimension_numbers = #tpu.dot_dimension_numbers<[1], [0], [0], [1], [0, 0, 1, 1], [], []>} : vector<8x128xbf16>, vector<128x128xbf16>, vector<8x128xf32> -> vector<8x128xf32>
    %c6_43 = arith.constant 6 : index
    %c0_44 = arith.constant 0 : index
    %60 = vector.load %arg2[%c6_43, %c0_44] : memref<8x128xf32, #tpu.memory_space<vmem>>, vector<1x128xf32>
    %61 = vector.broadcast %60 : vector<1x128xf32> to vector<8x128xf32>
    %62 = arith.addf %59, %61 : vector<8x128xf32>
    %cst_45 = arith.constant 0.000000e+00 : f32
    %63 = vector.broadcast %cst_45 : f32 to vector<8x128xf32>
    %64 = arith.maximumf %62, %63 : vector<8x128xf32>
    %65 = arith.truncf %64 : vector<8x128xf32> to vector<8x128xbf16>
    %c7 = arith.constant 7 : index
    %c0_46 = arith.constant 0 : index
    %c0_47 = arith.constant 0 : index
    %66 = vector.load %arg1[%c7, %c0_46, %c0_47] : memref<8x128x128xbf16, #tpu.memory_space<vmem>>, vector<1x128x128xbf16>
    %67 = vector.shape_cast %66 : vector<1x128x128xbf16> to vector<128x128xbf16>
    %cst_48 = arith.constant dense<0.000000e+00> : vector<8x128xf32>
    %68 = tpu.matmul %65, %67, %cst_48 {dimension_numbers = #tpu.dot_dimension_numbers<[1], [0], [0], [1], [0, 0, 1, 1], [], []>} : vector<8x128xbf16>, vector<128x128xbf16>, vector<8x128xf32> -> vector<8x128xf32>
    %c7_49 = arith.constant 7 : index
    %c0_50 = arith.constant 0 : index
    %69 = vector.load %arg2[%c7_49, %c0_50] : memref<8x128xf32, #tpu.memory_space<vmem>>, vector<1x128xf32>
    %70 = vector.broadcast %69 : vector<1x128xf32> to vector<8x128xf32>
    %71 = arith.addf %68, %70 : vector<8x128xf32>
    %cst_51 = arith.constant 0.000000e+00 : f32
    %72 = vector.broadcast %cst_51 : f32 to vector<8x128xf32>
    %73 = arith.maximumf %71, %72 : vector<8x128xf32>
    %c2_52 = arith.constant 2 : index
    %c0_53 = arith.constant 0 : index
    %c0_54 = arith.constant 0 : index
    %74 = vector.load %arg3[%c2_52, %c0_53, %c0_54] : memref<3x8x128xf32, #tpu.memory_space<vmem>>, vector<1x8x128xf32>
    %75 = vector.shape_cast %74 : vector<1x8x128xf32> to vector<8x128xf32>
    %76 = vector.shape_cast %73 : vector<8x128xf32> to vector<1x8x128xf32>
    tpu.vector_store %arg3[%c2_52, %c0_53, %c0_54], %76 {strides = array<i32>} : memref<3x8x128xf32, #tpu.memory_space<vmem>>, vector<1x8x128xf32>,
    return
  }
}

</mosaic_0001>

<bundles_post_ra>
// kernel: _lambda_.1
= control target key start
LH: loop header
LB: loop body
LE: loop exit
PB: predicated region body
PF: predicated region fallthrough
CT: control target
= control target key end

     0   :  { %8 = vsyncpa [#allocation3], 0  ;;  %s1325_s12 = smov [#allocation2]   ;;  %s1466_s0 = inlined_call_operand.vmem [shape: f32[8,128], index: 0, kind: input, shape index: {}]   ;;  %s1467_s1 = inlined_call_operand.hbm [shape: bf16[8,128,128], index: 1, kind: input, shape index: {}]   ;;  %s1468_s2 = inlined_call_operand.vmem [shape: f32[8,128], index: 2, kind: input, shape index: {}]   ;;  %s1469_s3 = inlined_call_operand.vmem [shape: f32[3,8,128], index: 3, kind: output, shape index: {}]  }
   0x1   :  { %s16_s13 = sshll.u32 %s1325_s12, 4  ;;  %s17_s13 = int_to_ptr.vmem [resolvable:$true] %s16_s13 }
   0x2   :  { %s1311_s14 = scalar_lea.vmem %s17_s13, 8192  ;;  %p1316_p1 = scmp.lt.s32.totalorder %s17_s13, %s17_s13 }
   0x3   :  { %p1312_p0 = scmp.ne.s32.totalorder %s17_s13, %s1311_s14  ;;  %p1317_p2 = scmp.lt.s32.totalorder %s1311_s14, %s1311_s14 }
   0x5   :  { %p1318_p3 = por %p1317_p2, %p1316_p1 }
   0x7   :  { %p1319_p4 = pnand %p1318_p3, %p1312_p0 }
   0x9   :  { %1322 = shalt.err (!%p1319_p4)
}
   0xa   :  { %s1326_s15 = smov 64   ;;  %s1327_s16 = smov 4  }
   0xb   :  { %22 = dma.hbm_to_vmem [thread:$0]  %s1467_s1, 8192, %s17_s13, [#allocation3], %s1326_s15, %s1326_s15, %s1327_s16  }
   0xc   :  { %1323 = dma.done.wait [#allocation3], 8192  }
   0xd   :  { %1324 = vsyncadd [#allocation3], 4294959104  ;;  %v1328_v0 = vmov 0.0   ;;  %vm1329_vm0 = vmmov 0   ;;  %v1239_v1 = vld [vmem:[#allocation2 + $0x38] sm:$0xff]   ;;  %v1240_v2 = vld [vmem:[#allocation2 + $0x30] sm:$0xff]  }
   0xe   :  { %1074 = vmatprep.subr.bf16.mxu0 %v1328_v0  ;;  %1090 = vmatprep.mubr.msk.bf16.mxu0 %vm1329_vm0, %v1328_v0  ;;  %v1241_v3 = vld [vmem:[#allocation2 + $0x28] sm:$0xff]   ;;  %v1247_v4 = vld [vmem:[#allocation2 + $0x78] sm:$0xff]   ;;  %v1242_v5 = vld [vmem:[#allocation2 + $0x20] sm:$0xff]  }
   0xf   :  { %1094 = vmatprep.subr.bf16.mxu1 %v1328_v0  ;;  %1110 = vmatprep.mubr.msk.bf16.mxu1 %vm1329_vm0, %v1328_v0  ;;  %v1248_v6 = vld [vmem:[#allocation2 + $0x70] sm:$0xff]   ;;  %v1243_v7 = vld [vmem:[#allocation2 + $0x18] sm:$0xff]   ;;  %v1249_v8 = vld [vmem:[#allocation2 + $0x68] sm:$0xff]  }
  0x10   :  { %1075 = vmatpush3.bf16.msra.mxu0 %v1239_v1  ;;  %1095 = vmatpush3.bf16.msra.mxu1 %v1247_v4  ;;  %v1244_v9 = vld [vmem:[#allocation2 + $0x10] sm:$0xff]   ;;  %v1250_v10 = vld [vmem:[#allocation2 + $0x60] sm:$0xff]   ;;  %v1245_v11 = vld [vmem:[#allocation2 + $0x8] sm:$0xff]  }
  0x11   :  { %1076 = vmatprep.subr.bf16.mxu0 %v1328_v0  ;;  %1096 = vmatprep.subr.bf16.mxu1 %v1328_v0  ;;  %v1251_v12 = vld [vmem:[#allocation2 + $0x58] sm:$0xff]   ;;  %v1246_v13 = vld [vmem:[#allocation2] sm:$0xff]   ;;  %v1252_v15 = vld [vmem:[#allocation2 + $0x50] sm:$0xff]  }
  0x12   :  { %v29_v14 = vld [vmem:[%s1466_s0] sm:$0xff]  ;;  %v1253_v17 = vld [vmem:[#allocation2 + $0x48] sm:$0xff]   ;;  %v1255_v19 = vld [vmem:[#allocation2 + $0xb8] sm:$0xff]  }
  0x13   :  { %v30_v16 = vpack.c.bf16 %v29_v14, %v29_v14  ;;  %v1254_v18 = vld [vmem:[#allocation2 + $0x40] sm:$0xff]   ;;  %v1256_v20 = vld [vmem:[#allocation2 + $0xb0] sm:$0xff]   ;;  %v1257_v21 = vld [vmem:[#allocation2 + $0xa8] sm:$0xff]  }
  0x14   :  { %1077 = vmatpush3.bf16.msra.mxu0 %v1240_v2  ;;  %1097 = vmatpush3.bf16.msra.mxu1 %v1248_v6  ;;  %v1258_v22 = vld [vmem:[#allocation2 + $0xa0] sm:$0xff]   ;;  %v1259_v23 = vld [vmem:[#allocation2 + $0x98] sm:$0xff]   ;;  %v1260_v24 = vld [vmem:[#allocation2 + $0x90] sm:$0xff]  }
  0x15   :  { %1078 = vmatprep.subr.bf16.mxu0 %v1328_v0  ;;  %1098 = vmatprep.subr.bf16.mxu1 %v1328_v0  ;;  %v929_v25 = vld [vmem:[%s1468_s2] ss:$0 sm:$0xff]  ;;  %v1261_v33 = vld [vmem:[#allocation2 + $0x88] sm:$0xff]   ;;  %v1263_v35 = vld [vmem:[#allocation2 + $0xf8] sm:$0xff]  }
  0x16   :  { %v1262_v34 = vld [vmem:[#allocation2 + $0x80] sm:$0xff]   ;;  %v1264_v36 = vld [vmem:[#allocation2 + $0xf0] sm:$0xff]   ;;  %v1265_v37 = vld [vmem:[#allocation2 + $0xe8] sm:$0xff]  }
  0x17   :  { %v1266_v38 = vld [vmem:[#allocation2 + $0xe0] sm:$0xff]   ;;  %v1267_v39 = vld [vmem:[#allocation2 + $0xd8] sm:$0xff]   ;;  %v1268_v40 = vld [vmem:[#allocation2 + $0xd0] sm:$0xff]  }
  0x18   :  { %1079 = vmatpush3.bf16.msra.mxu0 %v1241_v3  ;;  %1099 = vmatpush3.bf16.msra.mxu1 %v1249_v8  ;;  %v938_v41 = vld [vmem:[%s1468_s2 + $0x1] ss:$0 sm:$0xff]  ;;  %v1269_v49 = vld [vmem:[#allocation2 + $0xc8] sm:$0xff]   ;;  %v1271_v51 = vld [vmem:[#allocation2 + $0x138] sm:$0xff]  }
  0x19   :  { %1080 = vmatprep.subr.bf16.mxu0 %v1328_v0  ;;  %1100 = vmatprep.subr.bf16.mxu1 %v1328_v0  ;;  %v1270_v50 = vld [vmem:[#allocation2 + $0xc0] sm:$0xff]   ;;  %v1272_v52 = vld [vmem:[#allocation2 + $0x130] sm:$0xff]   ;;  %v1273_v53 = vld [vmem:[#allocation2 + $0x128] sm:$0xff]  }
  0x1a   :  { %v1274_v54 = vld [vmem:[#allocation2 + $0x120] sm:$0xff]   ;;  %v1275_v55 = vld [vmem:[#allocation2 + $0x118] sm:$0xff]   ;;  %v1276_v56 = vld [vmem:[#allocation2 + $0x110] sm:$0xff]  }
  0x1b   :  { %v1277_v57 = vld [vmem:[#allocation2 + $0x108] sm:$0xff]   ;;  %v947_v58 = vld [vmem:[%s1468_s2 + $0x2] ss:$0 sm:$0xff]  ;;  %v1279_v4 = vld [vmem:[#allocation2 + $0x178] sm:$0xff]  }
  0x1c   :  { %1081 = vmatpush3.bf16.msra.mxu0 %v1242_v5  ;;  %1101 = vmatpush3.bf16.msra.mxu1 %v1250_v10  ;;  %v1278_v3 = vld [vmem:[#allocation2 + $0x100] sm:$0xff]   ;;  %v1280_v5 = vld [vmem:[#allocation2 + $0x170] sm:$0xff]   ;;  %v1281_v6 = vld [vmem:[#allocation2 + $0x168] sm:$0xff]  }
  0x1d   :  { %1082 = vmatprep.subr.bf16.mxu0 %v1328_v0  ;;  %1102 = vmatprep.subr.bf16.mxu1 %v1328_v0  ;;  %v1283_v8 = vld [vmem:[#allocation2 + $0x158] sm:$0xff]  }
  0x20   :  { %1083 = vmatpush3.bf16.msra.mxu0 %v1243_v7  ;;  %1103 = vmatpush3.bf16.msra.mxu1 %v1251_v12  ;;  %v1282_v7 = vld [vmem:[#allocation2 + $0x160] sm:$0xff]  }
  0x21   :  { %1084 = vmatprep.subr.bf16.mxu0 %v1328_v0  ;;  %1104 = vmatprep.subr.bf16.mxu1 %v1328_v0 }
  0x24   :  { %1085 = vmatpush3.bf16.msra.mxu0 %v1244_v9  ;;  %1105 = vmatpush3.bf16.msra.mxu1 %v1252_v15  ;;  %v1284_v9 = vld [vmem:[#allocation2 + $0x150] sm:$0xff]   ;;  %v1285_v15 = vld [vmem:[#allocation2 + $0x148] sm:$0xff]  }
  0x25   :  { %1086 = vmatprep.subr.bf16.mxu0 %v1328_v0  ;;  %1106 = vmatprep.subr.bf16.mxu1 %v1328_v0 }
  0x28   :  { %1087 = vmatpush3.bf16.msra.mxu0 %v1245_v11  ;;  %1107 = vmatpush3.bf16.msra.mxu1 %v1253_v17  ;;  %v1287_v17 = vld [vmem:[#allocation2 + $0x1b8] sm:$0xff]  }
  0x29   :  { %1088 = vmatprep.subr.bf16.mxu0 %v1328_v0  ;;  %1108 = vmatprep.subr.bf16.mxu1 %v1328_v0 }
  0x2c   :  { %1089 = vmatpush3.bf16.msra.mxu0 %v1246_v13  ;;  %1109 = vmatpush3.bf16.msra.mxu1 %v1254_v18  ;;  %v1288_v18 = vld [vmem:[#allocation2 + $0x1b0] sm:$0xff]  }
  0x2d   :  { %1114 = vmatprep.subr.bf16.mxu0 %v1328_v0  ;;  %1134 = vmatprep.subr.bf16.mxu1 %v1328_v0 }
  0x2f   :  { %1091 = vmatmul.mubr.bf16.vlgmr.msra.gmra.mxu0 %v30_v16  ;;  %v1286_v16 = vld [vmem:[#allocation2 + $0x140] sm:$0xff]  }
  0x30   :  { %1130 = vmatprep.mubr.msk.bf16.mxu0 %vm1329_vm0, %v1328_v0  ;;  %1115 = vmatpush3.bf16.msra.mxu0 %v1255_v19  ;;  %v1289_v19 = vld [vmem:[#allocation2 + $0x1a8] sm:$0xff]  }
  0x31   :  { %1116 = vmatprep.subr.bf16.mxu0 %v1328_v0 }
  0x34   :  { %1117 = vmatpush3.bf16.msra.mxu0 %v1256_v20  ;;  %v1290_v20 = vld [vmem:[#allocation2 + $0x1a0] sm:$0xff]  }
  0x35   :  { %1118 = vmatprep.subr.bf16.mxu0 %v1328_v0 }
  0x38   :  { %1119 = vmatpush3.bf16.msra.mxu0 %v1257_v21  ;;  %v1291_v21 = vld [vmem:[#allocation2 + $0x198] sm:$0xff]  }
  0x39   :  { %1120 = vmatprep.subr.bf16.mxu0 %v1328_v0 }
  0x3c   :  { %1121 = vmatpush3.bf16.msra.mxu0 %v1258_v22  ;;  %v1292_v22 = vld [vmem:[#allocation2 + $0x190] sm:$0xff]  }
  0x3d   :  { %1122 = vmatprep.subr.bf16.mxu0 %v1328_v0 }
  0x40   :  { %1123 = vmatpush3.bf16.msra.mxu0 %v1259_v23  ;;  %v965_v23 = vld [vmem:[%s1468_s2 + $0x4] ss:$0 sm:$0xff] }
  0x41   :  { %1124 = vmatprep.subr.bf16.mxu0 %v1328_v0 }
  0x44   :  { %1125 = vmatpush3.bf16.msra.mxu0 %v1260_v24 }
  0x45   :  { %1126 = vmatprep.subr.bf16.mxu0 %v1328_v0 }
  0x48   :  { %1127 = vmatpush3.bf16.msra.mxu0 %v1261_v33  ;;  %v1295_v33 = vld [vmem:[#allocation2 + $0x1f8] sm:$0xff]  }
  0x49   :  { %1128 = vmatprep.subr.bf16.mxu0 %v1328_v0 }
  0x4c   :  { %1129 = vmatpush3.bf16.msra.mxu0 %v1262_v34  ;;  %v1296_v34 = vld [vmem:[#allocation2 + $0x1f0] sm:$0xff]  }
  0x4d   :  { %1154 = vmatprep.subr.bf16.mxu0 %v1328_v0 }
  0xef   :  { %v134_v26 = vpop.f32.mrf.mxu0 }
  0xf0   :  { %v135_v27 = vadd.f32 %v929_v25, %v134_v26 }
  0xf1   :  { %v1092_v28 = vpop.f32.mrf.mxu0 }
  0xf2   :  { %v140_v29 = vmax.f32 %v135_v27, 0.0 }
  0xf3   :  { %v137_v30 = vpop.f32.mrf.mxu0 }
  0xf4   :  { %v141_v31 = vpack.c.bf16 %v140_v29, %v140_v29 }
  0xf5   :  { %v1093_v32 = vpop.f32.mrf.mxu0 }
  0xf6   :  { %1111 = vmatmul.mubr.bf16.vlgmr.msra.gmra.mxu1 %v141_v31  ;;  %v1293_v31 = vld [vmem:[#allocation2 + $0x188] sm:$0xff]   ;;  %v1294_v32 = vld [vmem:[#allocation2 + $0x180] sm:$0xff]  }
  0xf7   :  { %1150 = vmatprep.mubr.msk.bf16.mxu1 %vm1329_vm0, %v1328_v0  ;;  %1135 = vmatpush3.bf16.msra.mxu1 %v1263_v35  ;;  %v1297_v35 = vld [vmem:[#allocation2 + $0x1e8] sm:$0xff]  }
  0xf8   :  { %1136 = vmatprep.subr.bf16.mxu1 %v1328_v0 }
  0xfb   :  { %1137 = vmatpush3.bf16.msra.mxu1 %v1264_v36  ;;  %v1298_v36 = vld [vmem:[#allocation2 + $0x1e0] sm:$0xff]  }
  0xfc   :  { %1138 = vmatprep.subr.bf16.mxu1 %v1328_v0 }
  0xff   :  { %1139 = vmatpush3.bf16.msra.mxu1 %v1265_v37  ;;  %v1299_v37 = vld [vmem:[#allocation2 + $0x1d8] sm:$0xff]  }
 0x100   :  { %1140 = vmatprep.subr.bf16.mxu1 %v1328_v0 }
 0x103   :  { %1141 = vmatpush3.bf16.msra.mxu1 %v1266_v38  ;;  %v1300_v38 = vld [vmem:[#allocation2 + $0x1d0] sm:$0xff]  }
 0x104   :  { %1142 = vmatprep.subr.bf16.mxu1 %v1328_v0 }
 0x107   :  { %1143 = vmatpush3.bf16.msra.mxu1 %v1267_v39  ;;  %v974_v39 = vld [vmem:[%s1468_s2 + $0x5] ss:$0 sm:$0xff] }
 0x108   :  { %1144 = vmatprep.subr.bf16.mxu1 %v1328_v0 }
 0x10b   :  { %1145 = vmatpush3.bf16.msra.mxu1 %v1268_v40 }
 0x10c   :  { %1146 = vmatprep.subr.bf16.mxu1 %v1328_v0 }
 0x10f   :  { %1147 = vmatpush3.bf16.msra.mxu1 %v1269_v49  ;;  %v983_v49 = vld [vmem:[%s1468_s2 + $0x6] ss:$0 sm:$0xff] }
 0x110   :  { %1148 = vmatprep.subr.bf16.mxu1 %v1328_v0 }
 0x113   :  { %1149 = vmatpush3.bf16.msra.mxu1 %v1270_v50 }
 0x114   :  { %1174 = vmatprep.subr.bf16.mxu1 %v1328_v0 }
 0x1b6   :  { %v246_v42 = vpop.f32.mrf.mxu1 }
 0x1b7   :  { %v247_v43 = vadd.f32 %v938_v41, %v246_v42 }
 0x1b8   :  { %v1112_v44 = vpop.f32.mrf.mxu1 }
 0x1b9   :  { %v252_v45 = vmax.f32 %v247_v43, 0.0 }
 0x1ba   :  { %v249_v46 = vpop.f32.mrf.mxu1 }
 0x1bb   :  { %v253_v47 = vpack.c.bf16 %v252_v45, %v252_v45 }
 0x1bc   :  { %v1113_v48 = vpop.f32.mrf.mxu1 }
 0x1bd   :  { %1131 = vmatmul.mubr.bf16.vlgmr.msra.gmra.mxu0 %v253_v47  ;;  %v1301_v47 = vld [vmem:[#allocation2 + $0x1c8] sm:$0xff]   ;;  %v1302_v48 = vld [vmem:[#allocation2 + $0x1c0] sm:$0xff]  }
 0x1be   :  { %1170 = vmatprep.mubr.msk.bf16.mxu0 %vm1329_vm0, %v1328_v0  ;;  %1155 = vmatpush3.bf16.msra.mxu0 %v1271_v51 }
 0x1bf   :  { %1156 = vmatprep.subr.bf16.mxu0 %v1328_v0 }
 0x1c2   :  { %1157 = vmatpush3.bf16.msra.mxu0 %v1272_v52 }
 0x1c3   :  { %1158 = vmatprep.subr.bf16.mxu0 %v1328_v0 }
 0x1c6   :  { %1159 = vmatpush3.bf16.msra.mxu0 %v1273_v53 }
 0x1c7   :  { %1160 = vmatprep.subr.bf16.mxu0 %v1328_v0 }
 0x1ca   :  { %1161 = vmatpush3.bf16.msra.mxu0 %v1274_v54 }
 0x1cb   :  { %1162 = vmatprep.subr.bf16.mxu0 %v1328_v0 }
 0x1ce   :  { %1163 = vmatpush3.bf16.msra.mxu0 %v1275_v55 }
 0x1cf   :  { %1164 = vmatprep.subr.bf16.mxu0 %v1328_v0 }
 0x1d2   :  { %1165 = vmatpush3.bf16.msra.mxu0 %v1276_v56 }
 0x1d3   :  { %1166 = vmatprep.subr.bf16.mxu0 %v1328_v0 }
 0x1d6   :  { %1167 = vmatpush3.bf16.msra.mxu0 %v1277_v57  ;;  %v992_v57 = vld [vmem:[%s1468_s2 + $0x7] ss:$0 sm:$0xff] }
 0x1d7   :  { %1168 = vmatprep.subr.bf16.mxu0 %v1328_v0 }
 0x1da   :  { %1169 = vmatpush3.bf16.msra.mxu0 %v1278_v3 }
 0x1db   :  { %1194 = vmatprep.subr.bf16.mxu0 %v1328_v0 }
 0x27d   :  { %v358_v59 = vpop.f32.mrf.mxu0 }
 0x27e   :  { %v359_v60 = vadd.f32 %v947_v58, %v358_v59 }
 0x27f   :  { %v1132_v61 = vpop.f32.mrf.mxu0 }
 0x280   :  { %v364_v62 = vmax.f32 %v359_v60, 0.0 }
 0x281   :  { %v361_v63 = vpop.f32.mrf.mxu0 }
 0x282   :  { %365 = vst [vmem:[%s1469_s3] sm:$0xff] %v364_v62  ;;  %v366_v1 = vpack.c.bf16 %v364_v62, %v364_v62 }
 0x283   :  { %v1133_v2 = vpop.f32.mrf.mxu0 }
 0x284   :  { %1151 = vmatmul.mubr.bf16.vlgmr.msra.gmra.mxu1 %v366_v1 }
 0x285   :  { %1190 = vmatprep.mubr.msk.bf16.mxu1 %vm1329_vm0, %v1328_v0  ;;  %1175 = vmatpush3.bf16.msra.mxu1 %v1279_v4 }
 0x286   :  { %1176 = vmatprep.subr.bf16.mxu1 %v1328_v0 }
 0x289   :  { %1177 = vmatpush3.bf16.msra.mxu1 %v1280_v5 }
 0x28a   :  { %1178 = vmatprep.subr.bf16.mxu1 %v1328_v0 }
 0x28d   :  { %1179 = vmatpush3.bf16.msra.mxu1 %v1281_v6 }
 0x28e   :  { %1180 = vmatprep.subr.bf16.mxu1 %v1328_v0 }
 0x291   :  { %1181 = vmatpush3.bf16.msra.mxu1 %v1282_v7 }
 0x292   :  { %1182 = vmatprep.subr.bf16.mxu1 %v1328_v0 }
 0x295   :  { %1183 = vmatpush3.bf16.msra.mxu1 %v1283_v8 }
 0x296   :  { %1184 = vmatprep.subr.bf16.mxu1 %v1328_v0 }
 0x299   :  { %1185 = vmatpush3.bf16.msra.mxu1 %v1284_v9 }
 0x29a   :  { %1186 = vmatprep.subr.bf16.mxu1 %v1328_v0 }
 0x29d   :  { %1187 = vmatpush3.bf16.msra.mxu1 %v1285_v15 }
 0x29e   :  { %1188 = vmatprep.subr.bf16.mxu1 %v1328_v0 }
 0x2a1   :  { %1189 = vmatpush3.bf16.msra.mxu1 %v1286_v16 }
 0x2a2   :  { %1214 = vmatprep.subr.bf16.mxu1 %v1328_v0 }
 0x344   :  { %v466_v10 = vpop.f32.mrf.mxu1 }
 0x345   :  { %964 = vst [vmem:[%s1469_s3 + $0x8] sm:$0xff] %v466_v10  ;;  %v474_v11 = vpack.c.bf16 %v466_v10, %v466_v10 }
 0x346   :  { %v1152_v12 = vpop.f32.mrf.mxu1 }
 0x347   :  { %1171 = vmatmul.mubr.bf16.vlgmr.msra.gmra.mxu0 %v474_v11 }
 0x348   :  { %v469_v13 = vpop.f32.mrf.mxu1  ;;  %1210 = vmatprep.mubr.msk.bf16.mxu0 %vm1329_vm0, %v1328_v0  ;;  %1195 = vmatpush3.bf16.msra.mxu0 %v1287_v17 }
 0x349   :  { %1196 = vmatprep.subr.bf16.mxu0 %v1328_v0 }
 0x34a   :  { %v1153_v14 = vpop.f32.mrf.mxu1 }
 0x34c   :  { %1197 = vmatpush3.bf16.msra.mxu0 %v1288_v18 }
 0x34d   :  { %1198 = vmatprep.subr.bf16.mxu0 %v1328_v0 }
 0x350   :  { %1199 = vmatpush3.bf16.msra.mxu0 %v1289_v19 }
 0x351   :  { %1200 = vmatprep.subr.bf16.mxu0 %v1328_v0 }
 0x354   :  { %1201 = vmatpush3.bf16.msra.mxu0 %v1290_v20 }
 0x355   :  { %1202 = vmatprep.subr.bf16.mxu0 %v1328_v0 }
 0x358   :  { %1203 = vmatpush3.bf16.msra.mxu0 %v1291_v21 }
 0x359   :  { %1204 = vmatprep.subr.bf16.mxu0 %v1328_v0 }
 0x35c   :  { %1205 = vmatpush3.bf16.msra.mxu0 %v1292_v22 }
 0x35d   :  { %1206 = vmatprep.subr.bf16.mxu0 %v1328_v0 }
 0x360   :  { %1207 = vmatpush3.bf16.msra.mxu0 %v1293_v31 }
 0x361   :  { %1208 = vmatprep.subr.bf16.mxu0 %v1328_v0 }
 0x364   :  { %1209 = vmatpush3.bf16.msra.mxu0 %v1294_v32 }
 0x407   :  { %v579_v24 = vpop.f32.mrf.mxu0 }
 0x408   :  { %v580_v25 = vadd.f32 %v965_v23, %v579_v24 }
 0x409   :  { %v1172_v26 = vpop.f32.mrf.mxu0 }
 0x40a   :  { %v585_v27 = vmax.f32 %v580_v25, 0.0 }
 0x40b   :  { %v582_v28 = vpop.f32.mrf.mxu0 }
 0x40c   :  { %v586_v29 = vpack.c.bf16 %v585_v27, %v585_v27 }
 0x40d   :  { %v1173_v30 = vpop.f32.mrf.mxu0 }
 0x40e   :  { %1191 = vmatmul.mubr.bf16.vlgmr.msra.gmra.mxu1 %v586_v29 }
 0x40f   :  { %1230 = vmatprep.mubr.msk.bf16.mxu1 %vm1329_vm0, %v1328_v0  ;;  %1215 = vmatpush3.bf16.msra.mxu1 %v1295_v33 }
 0x410   :  { %1216 = vmatprep.subr.bf16.mxu1 %v1328_v0 }
 0x413   :  { %1217 = vmatpush3.bf16.msra.mxu1 %v1296_v34 }
 0x414   :  { %1218 = vmatprep.subr.bf16.mxu1 %v1328_v0 }
 0x417   :  { %1219 = vmatpush3.bf16.msra.mxu1 %v1297_v35 }
 0x418   :  { %1220 = vmatprep.subr.bf16.mxu1 %v1328_v0 }
 0x41b   :  { %1221 = vmatpush3.bf16.msra.mxu1 %v1298_v36 }
 0x41c   :  { %1222 = vmatprep.subr.bf16.mxu1 %v1328_v0 }
 0x41f   :  { %1223 = vmatpush3.bf16.msra.mxu1 %v1299_v37 }
 0x420   :  { %1224 = vmatprep.subr.bf16.mxu1 %v1328_v0 }
 0x423   :  { %1225 = vmatpush3.bf16.msra.mxu1 %v1300_v38 }
 0x424   :  { %1226 = vmatprep.subr.bf16.mxu1 %v1328_v0 }
 0x427   :  { %1227 = vmatpush3.bf16.msra.mxu1 %v1301_v47 }
 0x428   :  { %1228 = vmatprep.subr.bf16.mxu1 %v1328_v0 }
 0x42b   :  { %1229 = vmatpush3.bf16.msra.mxu1 %v1302_v48 }
 0x4ce   :  { %v691_v40 = vpop.f32.mrf.mxu1 }
 0x4cf   :  { %v692_v41 = vadd.f32 %v974_v39, %v691_v40 }
 0x4d0   :  { %v1192_v42 = vpop.f32.mrf.mxu1 }
 0x4d1   :  { %v697_v43 = vmax.f32 %v692_v41, 0.0 }
 0x4d2   :  { %v694_v44 = vpop.f32.mrf.mxu1 }
 0x4d3   :  { %v698_v45 = vpack.c.bf16 %v697_v43, %v697_v43 }
 0x4d4   :  { %v1193_v46 = vpop.f32.mrf.mxu1 }
 0x4d5   :  { %1211 = vmatmul.mubr.bf16.vlgmr.msra.gmra.mxu0 %v698_v45 }
 0x595   :  { %v803_v50 = vpop.f32.mrf.mxu0 }
 0x596   :  { %v804_v51 = vadd.f32 %v983_v49, %v803_v50 }
 0x597   :  { %v1212_v52 = vpop.f32.mrf.mxu0 }
 0x598   :  { %v809_v53 = vmax.f32 %v804_v51, 0.0 }
 0x599   :  { %v806_v54 = vpop.f32.mrf.mxu0 }
 0x59a   :  { %v810_v55 = vpack.c.bf16 %v809_v53, %v809_v53 }
 0x59b   :  { %v1213_v56 = vpop.f32.mrf.mxu0 }
 0x59c   :  { %1231 = vmatmul.mubr.bf16.vlgmr.msra.gmra.mxu1 %v810_v55 }
 0x65c   :  { %v915_v58 = vpop.f32.mrf.mxu1 }
 0x65d   :  { %v916_v0 = vadd.f32 %v992_v57, %v915_v58 }
 0x65e   :  { %v1232_v59 = vpop.f32.mrf.mxu1 }
 0x65f   :  { %v921_v60 = vmax.f32 %v916_v0, 0.0 }
 0x660   :  { %v918_v61 = vpop.f32.mrf.mxu1 }
 0x661   :  { %1001 = vst [vmem:[%s1469_s3 + $0x10] sm:$0xff] %v921_v60 }
 0x662   :  { %v1233_v62 = vpop.f32.mrf.mxu1 }
 0x663   :  { %928 = vsyncpa [#allocation3], 1 }

</bundles_post_ra>
